<compile_context>
chip_gen: v7x
topology: tpu7x:2x2x1
jax: 0.10.0
libtpu: 0.0.40
codegen_flags: <defaults>
</compile_context>

<pallas_src>
import jax
import jax.numpy as jnp
from jax.experimental import pallas as pl
from jax.experimental.pallas import tpu as pltpu

HIDDEN = 256


def _round_up(n, m):
    return ((n + m - 1) // m) * m


def _make_soft_q_kernel(n_critics):
    """Kernel over one batch tile; weights for `n_critics` critics are resident."""

    def kernel(*refs):
        x_ref, a_ref = refs[0], refs[1]
        o_ref = refs[-1]
        # Cast activations to bf16 once; MXU accumulates in f32.
        xb = x_ref[...].astype(jnp.bfloat16)
        ab = a_ref[...].astype(jnp.bfloat16)
        qs = []
        for c in range(n_critics):
            w1x, w1a, b1, w2, b2, w3t, b3 = refs[2 + 7 * c: 2 + 7 * (c + 1)]
            # fc1 on the split weight (replaces the host-side concat).
            h1 = (jnp.dot(xb, w1x[...], preferred_element_type=jnp.float32)
                  + jnp.dot(ab, w1a[...], preferred_element_type=jnp.float32)
                  + b1[...])
            h1 = jnp.maximum(h1, 0.0)
            # fc2
            h2 = (jnp.dot(h1.astype(jnp.bfloat16), w2[...],
                          preferred_element_type=jnp.float32)
                  + b2[...])
            h2 = jnp.maximum(h2, 0.0)
            # fc3: [H] -> 1 is lane-sparse; use VPU multiply + cross-lane sum
            # (XLU) instead of an MXU pass that is mostly padding.
            q = jnp.sum(h2 * w3t[...], axis=-1, keepdims=True) + b3[...]
            qs.append(q)
        out = qs[0] if n_critics == 1 else jnp.concatenate(qs, axis=-1)
        o_ref[...] = out.astype(o_ref.dtype)

    return kernel


def soft_q_forward(x, a, *params_list, max_tile_b=256):
    """x: [B, obs_dim], a: [B, act_dim] -> q: [B, n_critics] (float32).

    Pass one param tuple for the plain module forward ([B, 1]); pass two to
    evaluate SAC's twin critics fused in a single pallas_call ([B, 2]).
    """
    n_critics = len(params_list)
    B, obs_dim = x.shape
    act_dim = a.shape[1]

    # Batch tile: sublane-aligned (multiple of 8), MXU-friendly cap of 256.
    tb = min(max_tile_b, _round_up(B, 8))
    b_pad = _round_up(B, tb)
    if b_pad != B:
        x = jnp.pad(x, ((0, b_pad - B), (0, 0)))
        a = jnp.pad(a, ((0, b_pad - B), (0, 0)))

    def tiled(shape):
        return pl.BlockSpec(shape, lambda i: (i, 0))

    def resident(arr):
        # Constant block index: DMA'd once, kept in VMEM across all batch tiles.
        return pl.BlockSpec(arr.shape, lambda i: (0, 0))

    in_specs = [tiled((tb, obs_dim)), tiled((tb, act_dim))]
    args = [x, a]
    for p in params_list:
        in_specs += [resident(t) for t in p]
        args += list(p)

    out = pl.pallas_call(
        _make_soft_q_kernel(n_critics),
        out_shape=jax.ShapeDtypeStruct((b_pad, n_critics), jnp.float32),
        grid=(b_pad // tb,),
        in_specs=in_specs,
        out_specs=pl.BlockSpec((tb, n_critics), lambda i: (i, 0)),
        compiler_params=pltpu.CompilerParams(
            dimension_semantics=("parallel",)),
    )(*args)
    return out[:B] if b_pad != B else out


def init_params(key, obs_dim, act_dim, hidden=HIDDEN, weight_dtype=jnp.bfloat16):
    """PyTorch nn.Linear default init: U(-1/sqrt(fan_in), 1/sqrt(fan_in)).

    Weights are stored transposed ([in, out]); fc1's weight is pre-split into
    obs/act halves; fc3's weight is stored as a row vector [1, H]. Matmul
    weights are bf16 (halves the dominant DMA), biases / fc3 stay f32.
    """
    in1 = obs_dim + act_dim
    key, k1w, k1b, k2w, k2b, k3w, k3b = jax.random.split(key, 7)

    def u(k, shape, fan_in):
        bound = 1.0 / (float(fan_in) ** 0.5)
        return jax.random.uniform(k, shape, jnp.float32, -bound, bound)

    w1 = u(k1w, (in1, hidden), in1)
    b1 = u(k1b, (1, hidden), in1)
    w2 = u(k2w, (hidden, hidden), hidden)
    b2 = u(k2b, (1, hidden), hidden)
    w3 = u(k3w, (hidden, 1), hidden)
    b3 = u(k3b, (1, 1), hidden)

    return (w1[:obs_dim].astype(weight_dtype),   # W1 (obs rows)   [obs, H]
            w1[obs_dim:].astype(weight_dtype),   # W1 (act rows)   [act, H]
            b1,                                  # b1              [1, H]  f32
            w2.astype(weight_dtype),             # W2              [H, H]
            b2,                                  # b2              [1, H]  f32
            w3.reshape(1, hidden),               # W3^T            [1, H]  f32
            b3)                                  # b3              [1, 1]  f32


def reference_forward(x, a, params):
    """Pure-JAX reference mirroring the kernel's bf16-weight / f32-accum math."""
    w1x, w1a, b1, w2, b2, w3t, b3 = params
    xb = x.astype(jnp.bfloat16)
    ab = a.astype(jnp.bfloat16)
    h1 = jnp.maximum(
        jnp.dot(xb, w1x, preferred_element_type=jnp.float32)
        + jnp.dot(ab, w1a, preferred_element_type=jnp.float32) + b1, 0.0)
    h2 = jnp.maximum(
        jnp.dot(h1.astype(jnp.bfloat16), w2,
                preferred_element_type=jnp.float32) + b2, 0.0)
    return jnp.sum(h2 * w3t, axis=-1, keepdims=True) + b3


if __name__ == "__main__":
    key = jax.random.PRNGKey(0)
    B, OBS_DIM, ACT_DIM = 8, 17, 6  # small MuJoCo-like env shapes

    key, kx, ka, kp1, kp2 = jax.random.split(key, 5)
    x = jax.random.normal(kx, (B, OBS_DIM), jnp.float32)
    a = jax.random.normal(ka, (B, ACT_DIM), jnp.float32)
    p1 = init_params(kp1, OBS_DIM, ACT_DIM)
    p2 = init_params(kp2, OBS_DIM, ACT_DIM)

    # 1) Single critic — matches the PyTorch module's forward semantics.
    q = jax.block_until_ready(soft_q_forward(x, a, p1))
    q_ref = reference_forward(x, a, p1)
    assert q.shape == (B, 1), q.shape
    assert jnp.allclose(q, q_ref, atol=2e-3, rtol=2e-3), "single-critic mismatch"

    # 2) Fused twin critics (SAC's Q1 + Q2 in one pallas_call).
    q12 = jax.block_until_ready(soft_q_forward(x, a, p1, p2))
    q12_ref = jnp.concatenate(
        [reference_forward(x, a, p1), reference_forward(x, a, p2)], axis=1)
    assert q12.shape == (B, 2), q12.shape
    assert jnp.allclose(q12, q12_ref, atol=2e-3, rtol=2e-3), "twin-critic mismatch"

    # 3) Larger, non-aligned batch: exercises padding + the parallel batch grid
    #    with weights held resident across tiles.
    kx2, ka2 = jax.random.split(key, 2)
    B2 = 300
    x2 = jax.random.normal(kx2, (B2, OBS_DIM), jnp.float32)
    a2 = jax.random.normal(ka2, (B2, ACT_DIM), jnp.float32)
    q2 = jax.block_until_ready(soft_q_forward(x2, a2, p1))
    q2_ref = reference_forward(x2, a2, p1)
    assert q2.shape == (B2, 1), q2.shape
    assert jnp.allclose(q2, q2_ref, atol=2e-3, rtol=2e-3), "batched-grid mismatch"

    print("KERNEL_OK")
</pallas_src>

<mosaic_0001>
module attributes {stable_mosaic.version = 11 : i64} {
  func.func @kernel(%arg0: i32, %arg1: memref<8x17xf32, #tpu.memory_space<vmem>>, %arg2: memref<8x6xf32, #tpu.memory_space<vmem>>, %arg3: memref<17x256xbf16, #tpu.memory_space<vmem>>, %arg4: memref<6x256xbf16, #tpu.memory_space<vmem>>, %arg5: memref<1x256xf32, #tpu.memory_space<vmem>>, %arg6: memref<256x256xbf16, #tpu.memory_space<vmem>>, %arg7: memref<1x256xf32, #tpu.memory_space<vmem>>, %arg8: memref<1x256xf32, #tpu.memory_space<vmem>>, %arg9: memref<1x1xf32, #tpu.memory_space<vmem>>, %arg10: memref<8x1xf32, #tpu.memory_space<vmem>>) attributes {dimension_semantics = [#tpu.dimension_semantics<parallel>], iteration_bounds = array<i64: 1>, scalar_prefetch = 0 : i64, scratch_operands = 0 : i64, tpu.core_type = #tpu.core_type<tc>, window_params = [{transform_indices = @transform_0, window_bounds = array<i64: 8, 17>}, {transform_indices = @transform_1, window_bounds = array<i64: 8, 6>}, {pipeline_mode = #tpu.pipeline_mode<synchronous>, transform_indices = @transform_2, window_bounds = array<i64: 17, 256>}, {pipeline_mode = #tpu.pipeline_mode<synchronous>, transform_indices = @transform_3, window_bounds = array<i64: 6, 256>}, {pipeline_mode = #tpu.pipeline_mode<synchronous>, transform_indices = @transform_4, window_bounds = array<i64: 1, 256>}, {pipeline_mode = #tpu.pipeline_mode<synchronous>, transform_indices = @transform_5, window_bounds = array<i64: 256, 256>}, {pipeline_mode = #tpu.pipeline_mode<synchronous>, transform_indices = @transform_6, window_bounds = array<i64: 1, 256>}, {pipeline_mode = #tpu.pipeline_mode<synchronous>, transform_indices = @transform_7, window_bounds = array<i64: 1, 256>}, {pipeline_mode = #tpu.pipeline_mode<synchronous>, transform_indices = @transform_8, window_bounds = array<i64: 1, 1>}, {transform_indices = @transform_9, window_bounds = array<i64: 8, 1>}]} {
    %c0 = arith.constant 0 : index
    %c0_0 = arith.constant 0 : index
    %0 = vector.load %arg1[%c0, %c0_0] : memref<8x17xf32, #tpu.memory_space<vmem>>, vector<8x17xf32>
    %1 = arith.truncf %0 : vector<8x17xf32> to vector<8x17xbf16>
    %c0_1 = arith.constant 0 : index
    %c0_2 = arith.constant 0 : index
    %2 = vector.load %arg2[%c0_1, %c0_2] : memref<8x6xf32, #tpu.memory_space<vmem>>, vector<8x6xf32>
    %3 = arith.truncf %2 : vector<8x6xf32> to vector<8x6xbf16>
    %c0_3 = arith.constant 0 : index
    %c0_4 = arith.constant 0 : index
    %4 = vector.load %arg3[%c0_3, %c0_4] : memref<17x256xbf16, #tpu.memory_space<vmem>>, vector<17x256xbf16>
    %cst = arith.constant dense<0.000000e+00> : vector<8x256xf32>
    %5 = tpu.matmul %1, %4, %cst {dimension_numbers = #tpu.dot_dimension_numbers<[1], [0], [0], [1], [0, 0, 1, 1], [], []>} : vector<8x17xbf16>, vector<17x256xbf16>, vector<8x256xf32> -> vector<8x256xf32>
    %c0_5 = arith.constant 0 : index
    %c0_6 = arith.constant 0 : index
    %6 = vector.load %arg4[%c0_5, %c0_6] : memref<6x256xbf16, #tpu.memory_space<vmem>>, vector<6x256xbf16>
    %cst_7 = arith.constant dense<0.000000e+00> : vector<8x256xf32>
    %7 = tpu.matmul %3, %6, %cst_7 {dimension_numbers = #tpu.dot_dimension_numbers<[1], [0], [0], [1], [0, 0, 1, 1], [], []>} : vector<8x6xbf16>, vector<6x256xbf16>, vector<8x256xf32> -> vector<8x256xf32>
    %8 = arith.addf %5, %7 : vector<8x256xf32>
    %c0_8 = arith.constant 0 : index
    %c0_9 = arith.constant 0 : index
    %9 = vector.load %arg5[%c0_8, %c0_9] : memref<1x256xf32, #tpu.memory_space<vmem>>, vector<1x256xf32>
    %10 = vector.broadcast %9 : vector<1x256xf32> to vector<8x256xf32>
    %11 = arith.addf %8, %10 : vector<8x256xf32>
    %cst_10 = arith.constant 0.000000e+00 : f32
    %12 = vector.broadcast %cst_10 : f32 to vector<8x256xf32>
    %13 = arith.maximumf %11, %12 : vector<8x256xf32>
    %14 = arith.truncf %13 : vector<8x256xf32> to vector<8x256xbf16>
    %c0_11 = arith.constant 0 : index
    %c0_12 = arith.constant 0 : index
    %15 = vector.load %arg6[%c0_11, %c0_12] : memref<256x256xbf16, #tpu.memory_space<vmem>>, vector<256x256xbf16>
    %cst_13 = arith.constant dense<0.000000e+00> : vector<8x256xf32>
    %16 = tpu.matmul %14, %15, %cst_13 {dimension_numbers = #tpu.dot_dimension_numbers<[1], [0], [0], [1], [0, 0, 1, 1], [], []>} : vector<8x256xbf16>, vector<256x256xbf16>, vector<8x256xf32> -> vector<8x256xf32>
    %c0_14 = arith.constant 0 : index
    %c0_15 = arith.constant 0 : index
    %17 = vector.load %arg7[%c0_14, %c0_15] : memref<1x256xf32, #tpu.memory_space<vmem>>, vector<1x256xf32>
    %18 = vector.broadcast %17 : vector<1x256xf32> to vector<8x256xf32>
    %19 = arith.addf %16, %18 : vector<8x256xf32>
    %cst_16 = arith.constant 0.000000e+00 : f32
    %20 = vector.broadcast %cst_16 : f32 to vector<8x256xf32>
    %21 = arith.maximumf %19, %20 : vector<8x256xf32>
    %c0_17 = arith.constant 0 : index
    %c0_18 = arith.constant 0 : index
    %22 = vector.load %arg8[%c0_17, %c0_18] : memref<1x256xf32, #tpu.memory_space<vmem>>, vector<1x256xf32>
    %23 = vector.broadcast %22 : vector<1x256xf32> to vector<8x256xf32>
    %24 = arith.mulf %21, %23 : vector<8x256xf32>
    %cst_19 = arith.constant dense<0.000000e+00> : vector<8xf32>
    %25 = vector.multi_reduction <add>, %24, %cst_19 [1] : vector<8x256xf32> to vector<8xf32>
    %26 = vector.shape_cast %25 : vector<8xf32> to vector<8x1xf32>
    %c0_20 = arith.constant 0 : index
    %c0_21 = arith.constant 0 : index
    %27 = vector.load %arg9[%c0_20, %c0_21] : memref<1x1xf32, #tpu.memory_space<vmem>>, vector<1x1xf32>
    %28 = vector.broadcast %27 : vector<1x1xf32> to vector<8x1xf32>
    %29 = arith.addf %26, %28 : vector<8x1xf32>
    %c0_22 = arith.constant 0 : index
    %c0_23 = arith.constant 0 : index
    %30 = vector.load %arg10[%c0_22, %c0_23] : memref<8x1xf32, #tpu.memory_space<vmem>>, vector<8x1xf32>
    tpu.vector_store %arg10[%c0_22, %c0_23], %29 {strides = array<i32>} : memref<8x1xf32, #tpu.memory_space<vmem>>, vector<8x1xf32>,
    return
  }
  func.func @transform_0(%arg0: i32) -> (i32, i32) {
    %c0_i32 = arith.constant 0 : i32
    %c0_i32_0 = arith.constant 0 : i32
    return %arg0, %c0_i32 : i32, i32
  }
  func.func @transform_1(%arg0: i32) -> (i32, i32) {
    %c0_i32 = arith.constant 0 : i32
    %c0_i32_0 = arith.constant 0 : i32
    return %arg0, %c0_i32 : i32, i32
  }
  func.func @transform_2(%arg0: i32) -> (i32, i32) {
    %c0_i32 = arith.constant 0 : i32
    %c0_i32_0 = arith.constant 0 : i32
    %c0_i32_1 = arith.constant 0 : i32
    return %c0_i32, %c0_i32_0 : i32, i32
  }
  func.func @transform_3(%arg0: i32) -> (i32, i32) {
    %c0_i32 = arith.constant 0 : i32
    %c0_i32_0 = arith.constant 0 : i32
    %c0_i32_1 = arith.constant 0 : i32
    return %c0_i32, %c0_i32_0 : i32, i32
  }
  func.func @transform_4(%arg0: i32) -> (i32, i32) {
    %c0_i32 = arith.constant 0 : i32
    %c0_i32_0 = arith.constant 0 : i32
    %c0_i32_1 = arith.constant 0 : i32
    return %c0_i32, %c0_i32_0 : i32, i32
  }
  func.func @transform_5(%arg0: i32) -> (i32, i32) {
    %c0_i32 = arith.constant 0 : i32
    %c0_i32_0 = arith.constant 0 : i32
    %c0_i32_1 = arith.constant 0 : i32
    return %c0_i32, %c0_i32_0 : i32, i32
  }
  func.func @transform_6(%arg0: i32) -> (i32, i32) {
    %c0_i32 = arith.constant 0 : i32
    %c0_i32_0 = arith.constant 0 : i32
    %c0_i32_1 = arith.constant 0 : i32
    return %c0_i32, %c0_i32_0 : i32, i32
  }
  func.func @transform_7(%arg0: i32) -> (i32, i32) {
    %c0_i32 = arith.constant 0 : i32
    %c0_i32_0 = arith.constant 0 : i32
    %c0_i32_1 = arith.constant 0 : i32
    return %c0_i32, %c0_i32_0 : i32, i32
  }
  func.func @transform_8(%arg0: i32) -> (i32, i32) {
    %c0_i32 = arith.constant 0 : i32
    %c0_i32_0 = arith.constant 0 : i32
    %c0_i32_1 = arith.constant 0 : i32
    return %c0_i32, %c0_i32_0 : i32, i32
  }
  func.func @transform_9(%arg0: i32) -> (i32, i32) {
    %c0_i32 = arith.constant 0 : i32
    %c0_i32_0 = arith.constant 0 : i32
    return %arg0, %c0_i32 : i32, i32
  }
}

</mosaic_0001>

<bundles_post_ra>
// kernel: tpu_custom_call.1
= control target key start
LH: loop header
LB: loop body
LE: loop exit
PB: predicated region body
PF: predicated region fallthrough
CT: control target
= control target key end

     0   :  { %s840_s0 = inlined_call_operand.hbm [shape: f32[8,17], index: 0, kind: input, shape index: {}]   ;;  %s841_s1 = inlined_call_operand.hbm [shape: f32[8,6], index: 1, kind: input, shape index: {}]   ;;  %s842_s2 = inlined_call_operand.hbm [shape: bf16[17,256], index: 2, kind: input, shape index: {}]   ;;  %s843_s3 = inlined_call_operand.vmem [shape: bf16[6,256], index: 3, kind: input, shape index: {}]   ;;  %s844_s4 = inlined_call_operand.vmem [shape: f32[1,256], index: 4, kind: input, shape index: {}]   ;;  %s845_s5 = inlined_call_operand.hbm [shape: bf16[256,256], index: 5, kind: input, shape index: {}]   ;;  %s846_s6 = inlined_call_operand.vmem [shape: f32[1,256], index: 6, kind: input, shape index: {}]   ;;  %s847_s7 = inlined_call_operand.vmem [shape: f32[1,256], index: 7, kind: input, shape index: {}]   ;;  %s848_s8 = inlined_call_operand.<no memory space> [shape: f32[1,1], index: 8, kind: input, shape index: {}]   ;;  %s849_s9 = inlined_call_operand.vmem [shape: f32[8,1], index: 9, kind: output, shape index: {}]  }
   0x1   :  { %v14_v0 = vstv %s848_s8 }
   0x2   :  { %15 = vst [vmem:[#allocation2] sm:$0x1] %v14_v0 }
   0x3   :  { %16 = vsyncpa [#allocation4], 0 }
   0x4   :  { %17 = vsyncpa [#allocation6], 0 }
   0x5   :  { %18 = vsyncpa [#allocation9], 0  ;;  %s717_s11 = smov [#allocation5]   ;;  %s718_s13 = smov [#allocation3]  }
   0x6   :  { %s35_s12 = sshll.u32 %s717_s11, 4  ;;  %s25_s14 = sshll.u32 %s718_s13, 4  ;;  %s36_s12 = int_to_ptr.vmem [resolvable:$true] %s35_s12  ;;  %s26_s14 = int_to_ptr.vmem [resolvable:$true] %s25_s14 }
   0x7   :  { %s623_s17 = scalar_lea.hbm %s841_s1, 128 }
   0x8   :  { %p624_p0 = scmp.ne.s32.totalorder %s841_s1, %s623_s17  ;;  %p627_p1 = scmp.lt.u32.totalorder %s623_s17, %s841_s1 }
   0xa   :  { %p629_p2 = pnand %p627_p1, %p624_p0 }
   0xc   :  { %632 = shalt.err (!%p629_p2)
}
   0xd   :  { %s633_s21 = scalar_lea.vmem %s36_s12, 128  ;;  %p638_p4 = scmp.lt.s32.totalorder %s36_s12, %s36_s12 }
   0xe   :  { %p634_p3 = scmp.ne.s32.totalorder %s36_s12, %s633_s21  ;;  %p639_p5 = scmp.lt.s32.totalorder %s633_s21, %s633_s21 }
  0x10   :  { %p640_p6 = por %p639_p5, %p638_p4 }
  0x12   :  { %p641_p7 = pnand %p640_p6, %p634_p3 }
  0x14   :  { %644 = shalt.err (!%p641_p7)
}
  0x15   :  { %38 = dma.hbm_to_vmem [thread:$0]  %s841_s1, 128, %s36_s12, [#allocation6]  }
  0x16   :  { %s645_s26 = scalar_lea.hbm %s840_s0, 128 }
  0x17   :  { %p646_p8 = scmp.ne.s32.totalorder %s840_s0, %s645_s26  ;;  %p649_p9 = scmp.lt.u32.totalorder %s645_s26, %s840_s0 }
  0x19   :  { %p651_p10 = pnand %p649_p9, %p646_p8 }
  0x1b   :  { %654 = shalt.err (!%p651_p10)
}
  0x1c   :  { %s655_s10 = scalar_lea.vmem %s26_s14, 128  ;;  %p660_p12 = scmp.lt.s32.totalorder %s26_s14, %s26_s14 }
  0x1d   :  { %p656_p11 = scmp.ne.s32.totalorder %s26_s14, %s655_s10  ;;  %p661_p13 = scmp.lt.s32.totalorder %s655_s10, %s655_s10 }
  0x1f   :  { %p662_p0 = por %p661_p13, %p660_p12 }
  0x21   :  { %p663_p1 = pnand %p662_p0, %p656_p11 }
  0x23   :  { %666 = shalt.err (!%p663_p1)
}
  0x24   :  { %28 = dma.hbm_to_vmem [thread:$0]  %s840_s0, 128, %s26_s14, [#allocation4]  }
  0x25   :  { %s719_s12 = smov [#allocation7]   ;;  %s667_s17 = scalar_lea.hbm %s842_s2, 384 }
  0x26   :  { %s44_s13 = sshll.u32 %s719_s12, 4  ;;  %p668_p2 = scmp.ne.s32.totalorder %s842_s2, %s667_s17  ;;  %s45_s13 = int_to_ptr.vmem [resolvable:$true] %s44_s13 }
  0x27   :  { %p671_p3 = scmp.lt.u32.totalorder %s667_s17, %s842_s2 }
  0x29   :  { %p673_p4 = pnand %p671_p3, %p668_p2 }
  0x2b   :  { %676 = shalt.err (!%p673_p4)
}
  0x2c   :  { %s677_s21 = scalar_lea.vmem %s45_s13, 384  ;;  %p682_p6 = scmp.lt.s32.totalorder %s45_s13, %s45_s13 }
  0x2d   :  { %p678_p5 = scmp.ne.s32.totalorder %s45_s13, %s677_s21  ;;  %p683_p7 = scmp.lt.s32.totalorder %s677_s21, %s677_s21 }
  0x2f   :  { %p684_p8 = por %p683_p7, %p682_p6 }
  0x31   :  { %p685_p9 = pnand %p684_p8, %p678_p5 }
  0x33   :  { %688 = shalt.err (!%p685_p9)
}
  0x34   :  { %s720_s0 = smov 128   ;;  %s721_s14 = smov 8  }
  0x35   :  { %50 = dma.hbm_to_vmem [thread:$0]  %s842_s2, 384, %s45_s13, [#allocation6], %s720_s0, %s720_s0, %s721_s14  }
  0x36   :  { %s722_s24 = smov [#allocation8]   ;;  %s689_s28 = scalar_lea.hbm %s845_s5, 4096 }
  0x37   :  { %s60_s25 = sshll.u32 %s722_s24, 4  ;;  %p690_p10 = scmp.ne.s32.totalorder %s845_s5, %s689_s28  ;;  %s61_s25 = int_to_ptr.vmem [resolvable:$true] %s60_s25 }
  0x38   :  { %p693_p11 = scmp.lt.u32.totalorder %s689_s28, %s845_s5 }
  0x3a   :  { %p695_p12 = pnand %p693_p11, %p690_p10 }
  0x3c   :  { %698 = shalt.err (!%p695_p12)
}
  0x3d   :  { %s699_s11 = scalar_lea.vmem %s61_s25, 4096  ;;  %p704_p0 = scmp.lt.s32.totalorder %s61_s25, %s61_s25 }
  0x3e   :  { %p700_p13 = scmp.ne.s32.totalorder %s61_s25, %s699_s11  ;;  %p705_p1 = scmp.lt.s32.totalorder %s699_s11, %s699_s11 }
  0x40   :  { %p706_p2 = por %p705_p1, %p704_p0 }
  0x42   :  { %p707_p3 = pnand %p706_p2, %p700_p13 }
  0x44   :  { %710 = shalt.err (!%p707_p3)
}
  0x45   :  { %66 = dma.hbm_to_vmem [thread:$0]  %s845_s5, 4096, %s61_s25, [#allocation9], %s720_s0, %s720_s0, %s721_s14  }
  0x46   :  { %711 = dma.done.wait [#allocation4], 128  }
  0x47   :  { %712 = vsyncadd [#allocation4], 4294967168 }
  0x48   :  { %713 = dma.done.wait [#allocation6], 512  }
  0x49   :  { %714 = vsyncadd [#allocation6], 4294966784 }
  0x4a   :  { %715 = dma.done.wait [#allocation9], 4096  }
  0x4b   :  { %716 = vsyncadd [#allocation9], 4294963200  ;;  %v723_v1 = vmov 0   ;;  %vm170_vm0 = vcmask 1040384   ;;  %v93_v2 = vld [vmem:[%s843_s3] sm:$0x77]  ;;  %v222_v50 = vlaneseq }
  0x4c   :  { %142 = vmatprep.mubr.bf16.mxu1 %v723_v1  ;;  %vm103_vm1 = vcmask 1042432   ;;  %v92_v3 = vld [vmem:[#allocation7 + $0x10] sm:$0x11]  ;;  %v88_v4 = vld [vmem:[#allocation5] sm:$0xff]  ;;  %v520_v5 = vcombine.high %v93_v2, %v93_v2  ;;  %v519_v6 = vcombine.low %v93_v2, %v93_v2  ;;  %v172_v7 = vsel %vm170_vm0, 65535, %v723_v1 }
  0x4d   :  { %v571_v8 = vld [vmem:[#allocation7] ss:$8 sps:$4 sm:$0xff]   ;;  %v573_v9 = vld [vmem:[#allocation7 + $0x4] ss:$8 sps:$4 sm:$0xff]   ;;  %v526_v10 = vcombine.high %v92_v3, %v92_v3  ;;  %v89_v12 = vpack.c.bf16 %v88_v4, %v88_v4  ;;  %v525_v15 = vcombine.low %v92_v3, %v92_v3  ;;  %vm99_vm2 = vcmask 48128   ;;  %v86_v21 = vld [vmem:[#allocation3] sm:$0xff] }
  0x4e   :  { %521 = vmatprep.subr.msk.bf16.mxu1 %vm103_vm1, %v520_v5  ;;  %v105_v11 = vsel %vm103_vm1, %v519_v6, 0  ;;  %v575_v13 = vld [vmem:[#allocation8 + $0x4] ss:$8 sps:$4 sm:$0xff]   ;;  %v577_v14 = vld [vmem:[#allocation8] ss:$8 sps:$4 sm:$0xff]   ;;  %v87_v23 = vpack.c.bf16 %v86_v21, %v86_v21  ;;  %vm166_vm3 = vcmask 138240  }
  0x4f   :  { %111 = vmatpush1.bf16.msra.mxu1 %v105_v11  ;;  %v578_v16 = vld [vmem:[#allocation8 + $0x14] ss:$8 sps:$4 sm:$0xff]   ;;  %v177_v17 = vand.u32 %v526_v10, %v172_v7  ;;  %442 = vmatprep.subr.bf16.mxu0 %v575_v13  ;;  %v580_v18 = vld [vmem:[#allocation8 + $0x10] ss:$8 sps:$4 sm:$0xff]   ;;  %v581_v19 = vld [vmem:[#allocation8 + $0x24] ss:$8 sps:$4 sm:$0xff]   ;;  %v174_v20 = vand.u32 %v525_v15, %v172_v7 }
  0x50   :  { %179 = vmatprep.subr.bf16.mxu1 %v573_v9  ;;  %443 = vmatpush1.bf16.msra.mxu0 %v577_v14  ;;  %v583_v22 = vld [vmem:[#allocation8 + $0x20] ss:$8 sps:$4 sm:$0xff]   ;;  %v584_v24 = vld [vmem:[#allocation8 + $0x34] ss:$8 sps:$4 sm:$0xff]   ;;  %v586_v25 = vld [vmem:[#allocation8 + $0x30] ss:$8 sps:$4 sm:$0xff]  }
  0x51   :  { %444 = vmatprep.subr.bf16.mxu0 %v578_v16  ;;  %v587_v26 = vld [vmem:[#allocation8 + $0x44] ss:$8 sps:$4 sm:$0xff]   ;;  %v589_v27 = vld [vmem:[#allocation8 + $0x40] ss:$8 sps:$4 sm:$0xff]   ;;  %v590_v28 = vld [vmem:[#allocation8 + $0x54] ss:$8 sps:$4 sm:$0xff]  }
  0x52   :  { %522 = vmatmul.mubr.msk.bf16.vlgmr.msra.gmra.mrb[0].mxu1 %vm99_vm2, %v89_v12  ;;  %v592_v29 = vld [vmem:[#allocation8 + $0x50] ss:$8 sps:$4 sm:$0xff]   ;;  %v593_v30 = vld [vmem:[#allocation8 + $0x64] ss:$8 sps:$4 sm:$0xff]   ;;  %v595_v31 = vld [vmem:[#allocation8 + $0x60] ss:$8 sps:$4 sm:$0xff]  }
  0x53   :  { %180 = vmatpush1.bf16.msra.mxu1 %v571_v8  ;;  %211 = vmatprep.mubr.bf16.mxu1 %v723_v1  ;;  %v596_v32 = vld [vmem:[#allocation8 + $0x74] ss:$8 sps:$4 sm:$0xff]   ;;  %v598_v33 = vld [vmem:[#allocation8 + $0x70] ss:$8 sps:$4 sm:$0xff]   ;;  %v599_v34 = vld [vmem:[#allocation8 + $0x84] ss:$8 sps:$4 sm:$0xff]  }
  0x54   :  { %181 = vmatprep.subr.bf16.mxu1 %v177_v17  ;;  %445 = vmatpush1.bf16.msra.mxu0 %v580_v18  ;;  %v601_v35 = vld [vmem:[#allocation8 + $0x80] ss:$8 sps:$4 sm:$0xff]   ;;  %v602_v36 = vld [vmem:[#allocation8 + $0x94] ss:$8 sps:$4 sm:$0xff]   ;;  %v604_v37 = vld [vmem:[#allocation8 + $0x90] ss:$8 sps:$4 sm:$0xff]  }
  0x55   :  { %446 = vmatprep.subr.bf16.mxu0 %v581_v19  ;;  %v605_v38 = vld [vmem:[#allocation8 + $0xa4] ss:$8 sps:$4 sm:$0xff]   ;;  %v607_v39 = vld [vmem:[#allocation8 + $0xa0] ss:$8 sps:$4 sm:$0xff]   ;;  %v608_v40 = vld [vmem:[#allocation8 + $0xb4] ss:$8 sps:$4 sm:$0xff]  }
  0x56   :  { %v610_v41 = vld [vmem:[#allocation8 + $0xb0] ss:$8 sps:$4 sm:$0xff]   ;;  %v611_v42 = vld [vmem:[#allocation8 + $0xc4] ss:$8 sps:$4 sm:$0xff]   ;;  %v613_v43 = vld [vmem:[#allocation8 + $0xc0] ss:$8 sps:$4 sm:$0xff]  }
  0x57   :  { %182 = vmatpush1.bf16.msra.mxu1 %v174_v20  ;;  %v614_v44 = vld [vmem:[#allocation8 + $0xd4] ss:$8 sps:$4 sm:$0xff]   ;;  %v616_v45 = vld [vmem:[#allocation8 + $0xd0] ss:$8 sps:$4 sm:$0xff]   ;;  %v617_v46 = vld [vmem:[#allocation8 + $0xe4] ss:$8 sps:$4 sm:$0xff]  }
  0x58   :  { %447 = vmatpush1.bf16.msra.mxu0 %v583_v22  ;;  %v619_v47 = vld [vmem:[#allocation8 + $0xe0] ss:$8 sps:$4 sm:$0xff]   ;;  %v620_v48 = vld [vmem:[#allocation8 + $0xf4] ss:$8 sps:$4 sm:$0xff]   ;;  %v622_v49 = vld [vmem:[#allocation8 + $0xf0] ss:$8 sps:$4 sm:$0xff]  }
  0x59   :  { %448 = vmatprep.subr.bf16.mxu0 %v584_v24  ;;  %v223_v51 = vshrl.u32 %v222_v50, 7  ;;  %v220_v57 = vld [vmem:[%s844_s4] sm:$0x3]  ;;  %vm510_vm4 = vcmask 7168  }
  0x5a   :  { %527 = vmatmul.mubr.msk.bf16.vlgmr.msra.gmra.mrb[4].mxu1 %vm166_vm3, %v87_v23  ;;  %v270_v9 = vld [vmem:[%s846_s6] sm:$0x3] }
  0x5b   :  { %v224_v56 = vsub.s32 0, %v223_v51  ;;  %v228_v58 = vsub.s32 1, %v223_v51  ;;  %v485_v12 = vld [vmem:[%s847_s7] sm:$0x3] }
  0x5c   :  { %449 = vmatpush1.bf16.msra.mxu0 %v586_v25 }
  0x5d   :  { %450 = vmatprep.subr.bf16.mxu0 %v587_v26  ;;  %v225_v59 = vrot.slane %v220_v57, %v224_v56  ;;  %v229_v61 = vrot.slane %v220_v57, %v228_v58  ;;  %v275_v10 = vrot.slane %v270_v9, %v224_v56  ;;  %v279_v11 = vrot.slane %v270_v9, %v228_v58  ;;  %v560_v26 = vld [vmem:[#allocation2] ss:$0 sm:$0xff] }
  0x5e   :  { %v490_v16 = vrot.slane %v485_v12, %v224_v56  ;;  %v494_v19 = vrot.slane %v485_v12, %v228_v58 }
  0x60   :  { %451 = vmatpush1.bf16.msra.mxu0 %v589_v27 }
  0x61   :  { %452 = vmatprep.subr.bf16.mxu0 %v590_v28 }
  0x64   :  { %453 = vmatpush1.bf16.msra.mxu0 %v592_v29 }
  0x65   :  { %454 = vmatprep.subr.bf16.mxu0 %v593_v30 }
  0x68   :  { %455 = vmatpush1.bf16.msra.mxu0 %v595_v31 }
  0x69   :  { %456 = vmatprep.subr.bf16.mxu0 %v596_v32 }
  0x6c   :  { %457 = vmatpush1.bf16.msra.mxu0 %v598_v33 }
  0x6d   :  { %458 = vmatprep.subr.bf16.mxu0 %v599_v34 }
  0x70   :  { %459 = vmatpush1.bf16.msra.mxu0 %v601_v35 }
  0x71   :  { %460 = vmatprep.subr.bf16.mxu0 %v602_v36 }
  0x74   :  { %461 = vmatpush1.bf16.msra.mxu0 %v604_v37 }
  0x75   :  { %462 = vmatprep.subr.bf16.mxu0 %v605_v38 }
  0x78   :  { %463 = vmatpush1.bf16.msra.mxu0 %v607_v39 }
  0x79   :  { %464 = vmatprep.subr.bf16.mxu0 %v608_v40 }
  0x7c   :  { %465 = vmatpush1.bf16.msra.mxu0 %v610_v41 }
  0x7d   :  { %466 = vmatprep.subr.bf16.mxu0 %v611_v42 }
  0x80   :  { %467 = vmatpush1.bf16.msra.mxu0 %v613_v43 }
  0x81   :  { %468 = vmatprep.subr.bf16.mxu0 %v614_v44 }
  0x84   :  { %469 = vmatpush1.bf16.msra.mxu0 %v616_v45 }
  0x85   :  { %470 = vmatprep.subr.bf16.mxu0 %v617_v46 }
  0x88   :  { %471 = vmatpush1.bf16.msra.mxu0 %v619_v47 }
  0x89   :  { %472 = vmatprep.subr.bf16.mxu0 %v620_v48 }
  0x8c   :  { %473 = vmatpush1.bf16.msra.mxu0 %v622_v49 }
 0x125   :  { %v144_v52 = vpop.f32.mrb[0].mxu1 }
 0x126   :  { %v146_v53 = vpop.f32.mrb[1].mxu1 }
 0x127   :  { %v148_v54 = vpop.f32.mrb[2].mxu1 }
 0x128   :  { %v149_v55 = vpop.f32.mrb[3].mxu1 }
 0x12d   :  { %v213_v60 = vpop.f32.mrb[4].mxu1 }
 0x12e   :  { %v214_v62 = vadd.f32 %v213_v60, %v144_v52  ;;  %v215_v63 = vpop.f32.mrb[5].mxu1 }
 0x12f   :  { %v216_v0 = vadd.f32 %v215_v63, %v146_v53  ;;  %v217_v1 = vpop.f32.mrb[6].mxu1 }
 0x130   :  { %v232_v2 = vadd.f32 %v225_v59, %v214_v62  ;;  %v218_v3 = vpop.f32.mrb[7].mxu1 }
 0x131   :  { %v233_v4 = vadd.f32 %v229_v61, %v216_v0 }
 0x132   :  { %v234_v5 = vmax.f32 %v232_v2, 0.0 }
 0x133   :  { %v235_v6 = vmax.f32 %v233_v4, 0.0 }
 0x134   :  { %v236_v8 = vpack.c.bf16 %v234_v5, %v234_v5 }
 0x135   :  { %v237_v7 = vpack.c.bf16 %v235_v6, %v235_v6 }
 0x137   :  { %474 = vmatprep.mubr.bf16.mxu0 %v237_v7 }
 0x138   :  { %475 = vmatmul.mubr.bf16.vlgmr.msra.gmra.mrb[0].mxu0 %v236_v8 }
 0x20b   :  { %v476_v13 = vpop.f32.mrb[0].mxu0 }
 0x20c   :  { %v477_v14 = vadd.f32 %v476_v13, %v275_v10  ;;  %v478_v15 = vpop.f32.mrb[1].mxu0 }
 0x20d   :  { %v479_v17 = vadd.f32 %v478_v15, %v279_v11  ;;  %v480_v18 = vpop.f32.mrb[2].mxu0 }
 0x20e   :  { %v483_v20 = vmax.f32 %v477_v14, 0.0  ;;  %v481_v21 = vpop.f32.mrb[3].mxu0 }
 0x20f   :  { %v484_v22 = vmax.f32 %v479_v17, 0.0 }
 0x210   :  { %v497_v23 = vmul.f32 %v490_v16, %v483_v20 }
 0x211   :  { %v498_v24 = vmul.f32 %v494_v19, %v484_v22 }
 0x213   :  { %v499_v25 = vadd.f32 %v498_v24, %v497_v23 }
 0x215   :  { %500 = vadd.xlane.f32.xlu0 %v499_v25 }
 0x2a2   :  { %v501_v27 = vpop.xlane.xlu0 %500 }
 0x2a3   :  { %v509_v28 = vadd.f32 %v560_v26, %v501_v27 }
 0x2a5   :  { %511 = vst.msk [vmem:[%s849_s9] sm:$0xff] %vm510_vm4, %v509_v28 }
 0x2a6   :  { %516 = vsyncpa [#allocation4], 1 }
 0x2a7   :  { %517 = vsyncpa [#allocation6], 1 }
 0x2a8   :  { %518 = vsyncpa [#allocation9], 1 }

</bundles_post_ra>
